<compile_context>
chip_gen: v7x
topology: tpu7x:2x2x1
jax: 0.10.0
libtpu: 0.0.40
codegen_flags: <defaults>
</compile_context>

<pallas_src>
import functools

import jax
import jax.numpy as jnp
from jax.experimental import pallas as pl
from jax.experimental.pallas import tpu as pltpu


def _qfl_elementwise(pred, t, *, beta, approx):
    """Per-element QFL: BCEwithLogits(pred, t) * |t - sigmoid(pred)|**beta.

    Uses a single exp per element:
      e = exp(-|x|); softplus(x) = max(x, 0) + log1p(e)
      sigmoid(x)  = 1/(1+e) for x >= 0, else e/(1+e)   (EUP reciprocal)
    """
    e = jnp.exp(-jnp.abs(pred))
    sp = jnp.maximum(pred, 0.0) + jnp.log1p(e)           # softplus == BCE(pred, 0)
    r = pl.reciprocal(1.0 + e, approx=approx)
    sig = jnp.where(pred >= 0.0, r, e * r)
    d = t - sig
    bce = sp - pred * t                                   # BCEwithLogits(pred, t)
    if beta == 2.0:
        mod = d * d                                       # VPU-only, no pow
    else:
        mod = jnp.power(jnp.abs(d), beta)
    return bce * mod


def _qfl_flat_kernel(pred_ref, t_ref, out_ref, *, beta, approx, n_rows, tile_rows):
    """Lane-dense path: pred/t are (R, 128) slabs of the flattened (N*C,) data.

    Emits one partial sum per tile, splat into a (1, 8, 128) aligned block.
    """
    i = pl.program_id(0)
    pred = pred_ref[...].astype(jnp.float32)
    t = t_ref[...]
    loss = _qfl_elementwise(pred, t, beta=beta, approx=approx)
    rowsum = jnp.sum(loss, axis=1, keepdims=True)         # (tile_rows, 1)
    if n_rows % tile_rows != 0:
        # Rows past R in the partial last tile hold unspecified VMEM data;
        # drop their (possibly non-finite) per-row sums before accumulating.
        rid = i * tile_rows + jax.lax.broadcasted_iota(jnp.int32, rowsum.shape, 0)
        rowsum = jnp.where(rid < n_rows, rowsum, 0.0)
    out_ref[...] = jnp.broadcast_to(jnp.sum(rowsum, keepdims=True), out_ref.shape)


def _qfl_rows_kernel(pred_ref, label_ref, score_ref, out_ref, *, beta, approx,
                     n_rows, tile_n, emit_partial):
    """(N, C) path: builds the dense target in-kernel from (label, score)."""
    i = pl.program_id(0)
    pred = pred_ref[...].astype(jnp.float32)               # (tile_n, C)
    label = label_ref[...]                                 # (tile_n, 1) int32
    score = score_ref[...]                                 # (tile_n, 1) f32

    num_classes = pred.shape[1]
    cls_ids = jax.lax.broadcasted_iota(jnp.int32, pred.shape, 1)
    sel = jnp.logical_and(cls_ids == label,
                          jnp.logical_and(label >= 0, label < num_classes))
    t = jnp.where(sel, score, 0.0)

    loss = _qfl_elementwise(pred, t, beta=beta, approx=approx)
    rowsum = jnp.sum(loss, axis=1, keepdims=True)          # (tile_n, 1)
    if n_rows % tile_n != 0:
        # Mask after the class reduction: per-row, not per-element.
        rid = i * tile_n + jax.lax.broadcasted_iota(jnp.int32, rowsum.shape, 0)
        rowsum = jnp.where(rid < n_rows, rowsum, 0.0)

    if emit_partial:
        out_ref[...] = jnp.broadcast_to(jnp.sum(rowsum, keepdims=True), out_ref.shape)
    else:
        out_ref[...] = rowsum


def quality_focal_loss_pallas(pred, label, score, *, beta=2.0, reduction="mean",
                              loss_weight=1.0, avg_factor=None,
                              approx_sigmoid=True, lane_dense=None,
                              tile_elems=512 * 1024):
    """pred: (N, C) f32/bf16 logits; label: (N,) int; score: (N,) float."""
    assert reduction in ("none", "mean", "sum")
    n, c = pred.shape
    if pred.dtype != jnp.bfloat16:
        pred = pred.astype(jnp.float32)        # bf16 inputs stay bf16 (half HBM bytes)
    itemsize = jnp.dtype(pred.dtype).itemsize
    padded_c = pl.cdiv(c, 128) * 128
    reduce_in_kernel = reduction in ("mean", "sum")
    beta = float(beta)

    # Lane-dense layout pays off when the (N, C) layout would waste >~25% of
    # the 128-wide lanes (the kernel is EUP/VALU-bound, not HBM-bound).
    if lane_dense is None:
        lane_dense = 4 * padded_c > 5 * c
    lane_dense = bool(lane_dense) and reduce_in_kernel

    compiler_params = pltpu.CompilerParams(
        dimension_semantics=("parallel",),        # lets v7x shard grid over both TCs
        vmem_limit_bytes=40 * 1024 * 1024)        # > v5e's 16 MiB scoped default

    per_sample = None
    total = None

    if lane_dense:
        # Dense target built once in XLA; pred/t flattened to lane-dense (R, 128).
        t = (jax.nn.one_hot(label.astype(jnp.int32), c, dtype=jnp.float32)
             * score.reshape(n, 1).astype(jnp.float32))
        total_elems = n * c
        r_rows = pl.cdiv(total_elems, 128)
        pad = r_rows * 128 - total_elems
        pred_flat = pred.reshape(total_elems)
        t_flat = t.reshape(total_elems)
        if pad:
            # pred=-100, t=0 contributes exactly 0 loss (sigmoid and d*d underflow).
            pred_flat = jnp.pad(pred_flat, (0, pad), constant_values=-100.0)
            t_flat = jnp.pad(t_flat, (0, pad))
        pred2 = pred_flat.reshape(r_rows, 128)
        t2 = t_flat.reshape(r_rows, 128)

        tile_rows = max(8, (tile_elems // 128) // 8 * 8)
        if r_rows <= tile_rows:
            tile_rows, grid_n = r_rows, 1
        else:
            grid_n = pl.cdiv(r_rows, tile_rows)

        kernel = functools.partial(_qfl_flat_kernel, beta=beta, approx=approx_sigmoid,
                                   n_rows=r_rows, tile_rows=tile_rows)
        cost = pl.CostEstimate(
            flops=12 * r_rows * 128,
            transcendentals=3 * r_rows * 128,
            bytes_accessed=(itemsize + 4) * r_rows * 128 + 4 * grid_n * 8 * 128)
        partials = pl.pallas_call(
            kernel,
            out_shape=jax.ShapeDtypeStruct((grid_n, 8, 128), jnp.float32),
            grid=(grid_n,),
            in_specs=[pl.BlockSpec((tile_rows, 128), lambda i: (i, 0)),
                      pl.BlockSpec((tile_rows, 128), lambda i: (i, 0))],
            out_specs=pl.BlockSpec((1, 8, 128), lambda i: (i, 0, 0)),
            compiler_params=compiler_params,
            cost_estimate=cost,
        )(pred2, t2)
        total = jnp.sum(partials[:, 0, 0])
    else:
        label2d = label.astype(jnp.int32).reshape(n, 1)
        score2d = score.astype(jnp.float32).reshape(n, 1)
        tile_n = max(8, (tile_elems // padded_c) // 8 * 8)
        if n <= tile_n:
            tile_n, grid_n = n, 1
        else:
            grid_n = pl.cdiv(n, tile_n)

        kernel = functools.partial(_qfl_rows_kernel, beta=beta, approx=approx_sigmoid,
                                   n_rows=n, tile_n=tile_n,
                                   emit_partial=reduce_in_kernel)
        in_specs = [pl.BlockSpec((tile_n, c), lambda i: (i, 0)),
                    pl.BlockSpec((tile_n, 1), lambda i: (i, 0)),
                    pl.BlockSpec((tile_n, 1), lambda i: (i, 0))]
        cost = pl.CostEstimate(
            flops=12 * n * padded_c,
            transcendentals=3 * n * padded_c,
            bytes_accessed=itemsize * n * c + 8 * n + 4 * n)

        if reduce_in_kernel:
            partials = pl.pallas_call(
                kernel,
                out_shape=jax.ShapeDtypeStruct((grid_n, 8, 128), jnp.float32),
                grid=(grid_n,),
                in_specs=in_specs,
                out_specs=pl.BlockSpec((1, 8, 128), lambda i: (i, 0, 0)),
                compiler_params=compiler_params,
                cost_estimate=cost,
            )(pred, label2d, score2d)
            total = jnp.sum(partials[:, 0, 0])
        else:
            per_sample = pl.pallas_call(
                kernel,
                out_shape=jax.ShapeDtypeStruct((n, 1), jnp.float32),
                grid=(grid_n,),
                in_specs=in_specs,
                out_specs=pl.BlockSpec((tile_n, 1), lambda i: (i, 0)),
                compiler_params=compiler_params,
                cost_estimate=cost,
            )(pred, label2d, score2d)

    # Reduction semantics mirror mmdet's weight_reduce_loss.
    if reduction == "none":
        result = per_sample.reshape(n)
    elif reduction == "sum":
        if avg_factor is not None:
            raise ValueError('avg_factor can not be used with reduction="sum"')
        result = total
    else:  # mean
        if avg_factor is None:
            result = total / jnp.float32(n)
        else:
            eps = jnp.finfo(jnp.float32).eps
            result = total / (jnp.asarray(avg_factor, jnp.float32) + eps)
    return loss_weight * result


class QualityFocalLossPallas:
    """Mirror of the PyTorch QualityFocalLoss module (use_sigmoid=True only)."""

    def __init__(self, use_sigmoid=True, beta=2.0, reduction="mean", loss_weight=1.0):
        assert use_sigmoid is True, "Only sigmoid in QFL supported now."
        self.use_sigmoid = use_sigmoid
        self.beta = beta
        self.reduction = reduction
        self.loss_weight = loss_weight

    def __call__(self, pred, target, weight=None, avg_factor=None,
                 reduction_override=None):
        assert reduction_override in (None, "none", "mean", "sum")
        reduction = reduction_override if reduction_override else self.reduction
        # TODO(synk): per-prediction `weight` from mmdet's weighted_loss decorator is
        # not wired into the kernel (the reference module's call path passes None).
        assert weight is None, "per-prediction weight not supported in this kernel"
        label, score = target
        return quality_focal_loss_pallas(
            pred, label, score, beta=self.beta, reduction=reduction,
            loss_weight=self.loss_weight, avg_factor=avg_factor)


if __name__ == "__main__":
    key = jax.random.PRNGKey(0)
    k1, k2, k3 = jax.random.split(key, 3)

    def ref_loss(pred, label, score, beta, reduction):
        pred = pred.astype(jnp.float32)
        sig = jax.nn.sigmoid(pred)
        sp = jax.nn.softplus(pred)
        neg = sp * sig ** beta
        pos = (sp - pred * score[:, None]) * jnp.abs(score[:, None] - sig) ** beta
        sel = (jax.lax.broadcasted_iota(jnp.int32, pred.shape, 1) == label[:, None]) \
              & (label[:, None] >= 0) & (label[:, None] < pred.shape[1])
        per = jnp.sum(jnp.where(sel, pos, neg), axis=1)
        if reduction == "mean":
            return jnp.mean(per)
        if reduction == "sum":
            return jnp.sum(per)
        return per

    def check(got, want, tol):
        got = jax.block_until_ready(got)
        assert jnp.allclose(got, want, rtol=tol, atol=tol), (got, want)

    # Small shapes: N deliberately not a multiple of 8/128 so the partial-tile
    # masks and the lane-dense tail pad are exercised.
    N, C = 20, 8
    pred = jax.random.normal(k1, (N, C), dtype=jnp.float32)
    label = jax.random.randint(k2, (N,), 0, C + 1, dtype=jnp.int32)   # C == background
    score = jax.random.uniform(k3, (N,), dtype=jnp.float32)

    qfl = QualityFocalLossPallas(use_sigmoid=True, beta=2.0, reduction="mean")

    # 1) module call: mean via the lane-dense path (C=8 -> flat (R,128) layout,
    #    96-element tail pad), approx EUP reciprocal -> loose tolerance.
    check(qfl(pred, (label, score)), ref_loss(pred, label, score, 2.0, "mean"), 5e-3)

    # 2) mean with exact sigmoid (approx reciprocal off) -> tight tolerance.
    check(quality_focal_loss_pallas(pred, label, score, approx_sigmoid=False),
          ref_loss(pred, label, score, 2.0, "mean"), 1e-5)

    # 3) sum and mean via the (N, C) path, tiled with a partial last tile
    #    (tile_elems=64 -> tile_n=8, grid=3, 4 masked rows).
    check(quality_focal_loss_pallas(pred, label, score, reduction="sum",
                                    lane_dense=False, tile_elems=64),
          ref_loss(pred, label, score, 2.0, "sum"), 5e-3)
    check(quality_focal_loss_pallas(pred, label, score, reduction="mean",
                                    lane_dense=False, tile_elems=64),
          ref_loss(pred, label, score, 2.0, "mean"), 5e-3)

    # 4) per-sample (reduction='none'), tiled (N, C) path with per-row output.
    check(quality_focal_loss_pallas(pred, label, score, reduction="none",
                                    tile_elems=64),
          ref_loss(pred, label, score, 2.0, "none"), 5e-3)

    # 5) lane-dense path with multiple tiles and a partial last tile:
    #    N2*C = 1280 -> R = 10 slab rows; tile_elems=1024 -> tile_rows=8, grid=2.
    N2 = 160
    pred2 = jax.random.normal(k1, (N2, C), dtype=jnp.float32)
    label2 = jax.random.randint(k2, (N2,), 0, C + 1, dtype=jnp.int32)
    score2 = jax.random.uniform(k3, (N2,), dtype=jnp.float32)
    check(quality_focal_loss_pallas(pred2, label2, score2, reduction="sum",
                                    tile_elems=1024),
          ref_loss(pred2, label2, score2, 2.0, "sum"), 5e-3)

    # 6) mean with avg_factor (mmdet weight_reduce_loss behavior).
    check(quality_focal_loss_pallas(pred, label, score, reduction="mean",
                                    avg_factor=10.0),
          jnp.sum(ref_loss(pred, label, score, 2.0, "none"))
          / (10.0 + jnp.finfo(jnp.float32).eps),
          5e-3)

    print("KERNEL_OK")
</pallas_src>

<mosaic_0001>
module attributes {stable_mosaic.version = 11 : i64} {
  func.func @_qfl_flat_kernel(%arg0: i32, %arg1: memref<2x128xf32, #tpu.memory_space<vmem>>, %arg2: memref<2x128xf32, #tpu.memory_space<vmem>>, %arg3: memref<1x8x128xf32, #tpu.memory_space<vmem>>) attributes {dimension_semantics = [#tpu.dimension_semantics<parallel>], iteration_bounds = array<i64: 1>, scalar_prefetch = 0 : i64, scratch_operands = 0 : i64, tpu.core_type = #tpu.core_type<tc>, window_params = [{transform_indices = @transform_0, window_bounds = array<i64: 2, 128>}, {transform_indices = @transform_1, window_bounds = array<i64: 2, 128>}, {transform_indices = @transform_2, window_bounds = array<i64: 1, 8, 128>}]} {
    %c0 = arith.constant 0 : index
    %c0_0 = arith.constant 0 : index
    %0 = vector.load %arg1[%c0, %c0_0] : memref<2x128xf32, #tpu.memory_space<vmem>>, vector<2x128xf32>
    %c0_1 = arith.constant 0 : index
    %c0_2 = arith.constant 0 : index
    %1 = vector.load %arg2[%c0_1, %c0_2] : memref<2x128xf32, #tpu.memory_space<vmem>>, vector<2x128xf32>
    %2 = math.absf %0 : vector<2x128xf32>
    %cst = arith.constant 0.000000e+00 : f32
    %3 = vector.broadcast %cst : f32 to vector<2x128xf32>
    %4 = arith.subf %3, %2 : vector<2x128xf32>
    %5 = math.exp %4 : vector<2x128xf32>
    %cst_3 = arith.constant 0.000000e+00 : f32
    %6 = vector.broadcast %cst_3 : f32 to vector<2x128xf32>
    %7 = arith.maximumf %0, %6 : vector<2x128xf32>
    %8 = math.log1p %5 : vector<2x128xf32>
    %9 = arith.addf %7, %8 : vector<2x128xf32>
    %cst_4 = arith.constant 1.000000e+00 : f32
    %10 = vector.broadcast %cst_4 : f32 to vector<2x128xf32>
    %11 = arith.addf %10, %5 : vector<2x128xf32>
    %12 = tpu.reciprocal %11 {approx = true} : vector<2x128xf32> -> vector<2x128xf32>
    %cst_5 = arith.constant 0.000000e+00 : f32
    %13 = vector.broadcast %cst_5 : f32 to vector<2x128xf32>
    %14 = arith.cmpf oge, %0, %13 : vector<2x128xf32>
    %15 = arith.mulf %5, %12 : vector<2x128xf32>
    %16 = arith.select %14, %12, %15 : vector<2x128xi1>, vector<2x128xf32>
    %17 = arith.subf %1, %16 : vector<2x128xf32>
    %18 = arith.mulf %0, %1 : vector<2x128xf32>
    %19 = arith.subf %9, %18 : vector<2x128xf32>
    %20 = arith.mulf %17, %17 : vector<2x128xf32>
    %21 = arith.mulf %19, %20 : vector<2x128xf32>
    %cst_6 = arith.constant dense<0.000000e+00> : vector<2xf32>
    %22 = vector.multi_reduction <add>, %21, %cst_6 [1] : vector<2x128xf32> to vector<2xf32>
    %23 = vector.shape_cast %22 : vector<2xf32> to vector<2x1xf32>
    %24 = vector.shape_cast %23 : vector<2x1xf32> to vector<1x2x1xf32>
    %cst_7 = arith.constant dense<0.000000e+00> : vector<1xf32>
    %25 = vector.multi_reduction <add>, %24, %cst_7 [1, 2] : vector<1x2x1xf32> to vector<1xf32>
    %26 = vector.shape_cast %25 : vector<1xf32> to vector<1x1x1xf32>
    %27 = vector.extract %26[0, 0, 0] : f32 from vector<1x1x1xf32>
    %28 = vector.broadcast %27 : f32 to vector<1x1xf32>
    %29 = vector.shape_cast %28 : vector<1x1xf32> to vector<1x1x1xf32>
    %30 = vector.broadcast %29 : vector<1x1x1xf32> to vector<1x8x128xf32>
    %c0_8 = arith.constant 0 : index
    %c0_9 = arith.constant 0 : index
    %c0_10 = arith.constant 0 : index
    %31 = vector.load %arg3[%c0_8, %c0_9, %c0_10] : memref<1x8x128xf32, #tpu.memory_space<vmem>>, vector<1x8x128xf32>
    tpu.vector_store %arg3[%c0_8, %c0_9, %c0_10], %30 {strides = array<i32>} : memref<1x8x128xf32, #tpu.memory_space<vmem>>, vector<1x8x128xf32>,
    return
  }
  func.func @transform_0(%arg0: i32) -> (i32, i32) {
    %c0_i32 = arith.constant 0 : i32
    %c0_i32_0 = arith.constant 0 : i32
    return %arg0, %c0_i32 : i32, i32
  }
  func.func @transform_1(%arg0: i32) -> (i32, i32) {
    %c0_i32 = arith.constant 0 : i32
    %c0_i32_0 = arith.constant 0 : i32
    return %arg0, %c0_i32 : i32, i32
  }
  func.func @transform_2(%arg0: i32) -> (i32, i32, i32) {
    %c0_i32 = arith.constant 0 : i32
    %c0_i32_0 = arith.constant 0 : i32
    %c0_i32_1 = arith.constant 0 : i32
    return %arg0, %c0_i32, %c0_i32_0 : i32, i32, i32
  }
}

</mosaic_0001>

<bundles_post_ra>
// kernel: tpu_custom_call.1
= control target key start
LH: loop header
LB: loop body
LE: loop exit
PB: predicated region body
PF: predicated region fallthrough
CT: control target
= control target key end

     0   :  { %7 = vsyncpa [#allocation3], 0  ;;  %s185_s0 = inlined_call_operand.hbm [shape: f32[2,128], index: 0, kind: input, shape index: {}]   ;;  %s186_s1 = inlined_call_operand.vmem [shape: f32[2,128], index: 1, kind: input, shape index: {}]   ;;  %s187_s2 = inlined_call_operand.hbm [shape: f32[1,8,128], index: 2, kind: output, shape index: {}]  }
   0x1   :  { %8 = vsyncpa [#allocation4], 0  ;;  %s141_s9 = smov [#allocation2]   ;;  %s93_s13 = scalar_lea.hbm %s185_s0, 32 }
   0x2   :  { %s15_s10 = sshll.u32 %s141_s9, 4  ;;  %p94_p0 = scmp.ne.s32.totalorder %s185_s0, %s93_s13  ;;  %s16_s10 = int_to_ptr.vmem [resolvable:$true] %s15_s10 }
   0x3   :  { %p97_p1 = scmp.lt.u32.totalorder %s93_s13, %s185_s0 }
   0x5   :  { %p99_p2 = pnand %p97_p1, %p94_p0 }
   0x7   :  { %102 = shalt.err (!%p99_p2)
}
   0x8   :  { %s103_s18 = scalar_lea.vmem %s16_s10, 32  ;;  %p108_p4 = scmp.lt.s32.totalorder %s16_s10, %s16_s10 }
   0x9   :  { %p104_p3 = scmp.ne.s32.totalorder %s16_s10, %s103_s18  ;;  %p109_p5 = scmp.lt.s32.totalorder %s103_s18, %s103_s18 }
   0xb   :  { %p110_p6 = por %p109_p5, %p108_p4 }
   0xd   :  { %p111_p7 = pnand %p110_p6, %p104_p3 }
   0xf   :  { %114 = shalt.err (!%p111_p7)
}
  0x10   :  { %18 = dma.hbm_to_vmem [thread:$0]  %s185_s0, 32, %s16_s10, [#allocation3]  }
  0x11   :  { %137 = dma.done.wait [#allocation3], 32  }
  0x12   :  { %138 = vsyncadd [#allocation3], 4294967264  ;;  %v24_v0 = vld [vmem:[#allocation2] sm:$0x3]  ;;  %vm51_vm2 = vcmask 1041408   ;;  %vm55_vm3 = vcmask 1024  }
  0x13   :  { %v26_v1 = vand.u32 2147483647, %v24_v0  ;;  %v25_v9 = vld [vmem:[%s186_s1] sm:$0x3]  ;;  %v30_v12 = vmax.f32 %v24_v0, 0.0  ;;  %vm43_vm1 = vcmp.ge.f32.partialorder %v24_v0, 0.0 }
  0x14   :  { %v47_v16 = vmul.f32 %v25_v9, %v24_v0  ;;  %s142_s0 = smov [#allocation5]  }
  0x15   :  { %v27_v2 = vsub.f32 0.0, %v26_v1  ;;  %s74_s1 = sshll.u32 %s142_s0, 4  ;;  %s75_s1 = int_to_ptr.vmem [resolvable:$true] %s74_s1 }
  0x16   :  { %s115_s24 = scalar_lea.vmem %s75_s1, 128  ;;  %p120_p9 = scmp.lt.s32.totalorder %s75_s1, %s75_s1 }
  0x17   :  { %v28_v3 = vmul.f32 1.442695, %v27_v2  ;;  %p116_p8 = scmp.ne.s32.totalorder %s75_s1, %s115_s24  ;;  %p121_p10 = scmp.lt.s32.totalorder %s115_s24, %s115_s24 }
  0x19   :  { %87 = vpow2.f32 %v28_v3  ;;  %p122_p11 = por %p121_p10, %p120_p9 }
  0x1b   :  { %p123_p12 = pnand %p122_p11, %p116_p8 }
  0x23   :  { %v88_v4 = vpop.eup %87 }
  0x24   :  { %v31_v5 = vadd.f32 1.0, %v88_v4  ;;  %v34_v6 = vmul.f32 -0.5, %v88_v4  ;;  %v37_v8 = vand.u32 2147483647, %v88_v4 }
  0x26   :  { %89 = vlog2.f32 %v31_v5  ;;  %v35_v7 = vadd.f32 1.0, %v34_v6  ;;  %vm38_vm0 = vcmp.lt.f32.partialorder %v37_v8, 0.0004427343 }
  0x27   :  { %91 = vrcp.f32 %v31_v5 }
  0x28   :  { %v36_v10 = vmul.f32 %v88_v4, %v35_v7 }
  0x30   :  { %v90_v11 = vpop.eup %89 }
  0x31   :  { %v92_v13 = vpop.eup %91  ;;  %v33_v14 = vmul.f32 0.6931472, %v90_v11 }
  0x32   :  { %v44_v15 = vmul.f32 %v92_v13, %v88_v4 }
  0x33   :  { %v39_v17 = vsel %vm38_vm0, %v36_v10, %v33_v14 }
  0x34   :  { %v40_v18 = vadd.f32 %v39_v17, %v30_v12  ;;  %v45_v19 = vsel %vm43_vm1, %v92_v13, %v44_v15 }
  0x35   :  { %v46_v20 = vsub.f32 %v25_v9, %v45_v19 }
  0x36   :  { %v48_v21 = vsub.f32 %v40_v18, %v47_v16 }
  0x37   :  { %v49_v22 = vmul.f32 %v46_v20, %v46_v20 }
  0x39   :  { %v50_v23 = vmul.f32 %v49_v22, %v48_v21 }
  0x3b   :  { %v52_v24 = vsel %vm51_vm2, %v50_v23, 0.0 }
  0x3c   :  { %53 = vadd.xlane.f32.xlu0 %v52_v24 }
  0xc9   :  { %v54_v25 = vpop.xlane.xlu0 %53 }
  0xca   :  { %v56_v26 = vsel %vm55_vm3, %v54_v25, 0.0 }
  0xcb   :  { %57 = vadd.xlane.f32.xlu0 %v56_v26 }
 0x158   :  { %v58_v27 = vpop.xlane.xlu0 %57 }
 0x159   :  { %v59_v28 = vrot.slane %v58_v27, 4 }
 0x15b   :  { %v60_v29 = vadd.f32 %v59_v28, %v58_v27 }
 0x15d   :  { %v61_v30 = vrot.slane %v60_v29, 2 }
 0x15f   :  { %v62_v31 = vadd.f32 %v61_v30, %v60_v29 }
 0x161   :  { %v63_v32 = vrot.slane %v62_v31, 1 }
 0x163   :  { %v64_v33 = vadd.f32 %v63_v32, %v62_v31 }
 0x165   :  { %83 = vpush %v64_v33 }
 0x196   :  { %s84_s23 = spop %83 }
 0x197   :  { %v66_v34 = vstv %s84_s23 }
 0x198   :  { %67 = vst [vmem:[#allocation5] sm:$0xff] %v66_v34 }
 0x199   :  { %126 = shalt.err (!%p123_p12)
}
 0x19a   :  { %s127_s27 = scalar_lea.hbm %s187_s2, 128 }
 0x19b   :  { %p128_p13 = scmp.ne.s32.totalorder %s187_s2, %s127_s27  ;;  %p131_p0 = scmp.lt.u32.totalorder %s127_s27, %s187_s2 }
 0x19d   :  { %p133_p1 = pnand %p131_p0, %p128_p13 }
 0x19f   :  { %136 = shalt.err (!%p133_p1)
}
 0x1a0   :  { %77 = dma.vmem_to_hbm [thread:$0]  %s75_s1, 128, %s187_s2, [#allocation4]  }
 0x1a1   :  { %139 = dma.done.wait [#allocation4], 128  }
 0x1a2   :  { %140 = vsyncadd [#allocation4], 4294967168 }
 0x1a3   :  { %81 = vsyncpa [#allocation3], 1 }
 0x1a4   :  { %82 = vsyncpa [#allocation4], 1 }

</bundles_post_ra>
